<compile_context>
chip_gen: v6e
topology: v6e:2x2x1
jax: 0.10.0
libtpu: 0.0.40
codegen_flags: <defaults>
</compile_context>

<pallas_src>
import functools

import jax
import jax.numpy as jnp
from jax.experimental import pallas as pl
from jax.experimental.pallas import tpu as pltpu

D_MODEL = 768   # DistilBERT hidden size
LANES = 128     # TPU vreg lane width


def _round_up(x: int, m: int) -> int:
    return ((x + m - 1) // m) * m


def joint_heads_kernel(h_ref, w_ref, b_ref, out_ref):
    """One fused, lane-dense head matmul per row tile.

    h_ref   : (TILE_M, D)     activations in native dtype (f32 here)
    w_ref   : (D, N_PAD)      bf16 concatenated [slot | intent | zero-pad] weights
    b_ref   : (1, N_PAD)      f32  concatenated bias (zero in padded columns)
    out_ref : (TILE_M, N_PAD) bf16 fused logits slab
    """
    acc = jnp.dot(h_ref[...].astype(jnp.bfloat16), w_ref[...],
                  preferred_element_type=jnp.float32)
    out_ref[...] = (acc + b_ref[...]).astype(out_ref.dtype)


def prepare_head_params(wi, bi, ws, bs):
    """One-time (model-load) packing of both heads into a lane-dense slab.

    Hoisted out of the per-call hot path so the forward pass is exactly one
    DMA of the ~192 KiB weight slab.
    """
    D = wi.shape[0]
    ni = int(wi.shape[-1])
    ns = int(ws.shape[-1])
    n_pad = _round_up(ns + ni, LANES)

    w_cat = jnp.zeros((D, n_pad), jnp.bfloat16)
    w_cat = w_cat.at[:, :ns].set(ws.astype(jnp.bfloat16))
    w_cat = w_cat.at[:, ns:ns + ni].set(wi.astype(jnp.bfloat16))

    b_cat = jnp.zeros((1, n_pad), jnp.float32)
    b_cat = b_cat.at[:, :ns].set(bs.reshape(1, ns).astype(jnp.float32))
    b_cat = b_cat.at[:, ns:ns + ni].set(bi.reshape(1, ni).astype(jnp.float32))
    return w_cat, b_cat, ns, ni


@functools.partial(jax.jit,
                   static_argnames=("num_slots", "num_intents", "tile_m"))
def joint_intent_and_slots(h, w_cat, b_cat, *, num_slots, num_intents,
                           tile_m=2048):
    """Fused intent + slot classification heads (Dropout is identity in eval).

    h      : (B, S, 768) hidden states from the backbone (native dtype)
    w_cat  : (768, N_PAD) bf16 packed weights   b_cat : (1, N_PAD) f32 bias

    Returns (intent_logits (B, NI) bf16, slot_logits (B, S, NS) bf16).
    """
    B, S, D = h.shape
    n_pad = w_cat.shape[-1]
    M = B * S
    h_flat = h.reshape(M, D)          # no dtype cast pass, no row-pad copy

    # Tile sizing: multiple of 16 unconditionally (covers bf16/f32 sublane
    # packing), no larger than M, and capped so the row grid has >= 2 steps
    # whenever M allows it (so "parallel" actually spans both v7x TCs).
    tile = max(16, _round_up(min(tile_m, M), 16))
    tile = min(tile, max(16, _round_up(pl.cdiv(M, 2), 16)))
    grid = (pl.cdiv(M, tile),)

    # Derive the VMEM budget from the actual working set (+ headroom) instead
    # of a blanket limit; stays well inside v7x's 64 MiB.
    itemsize_h = jnp.dtype(h.dtype).itemsize
    working_set = (2 * tile * D * itemsize_h      # double-buffered input tile
                   + 2 * tile * n_pad * 2         # double-buffered bf16 output
                   + 2 * D * n_pad * 2            # resident weight slab
                   + 2 * n_pad * 4)               # resident bias
    vmem_limit = min(64 * 1024 * 1024, int(1.5 * working_set) + (8 << 20))

    fused = pl.pallas_call(
        joint_heads_kernel,
        out_shape=jax.ShapeDtypeStruct((M, n_pad), jnp.bfloat16),
        grid_spec=pltpu.PrefetchScalarGridSpec(
            num_scalar_prefetch=0,
            grid=grid,
            in_specs=[
                pl.BlockSpec((tile, D), lambda i: (i, 0)),     # row tile
                # TODO(synk): the constant-index weight/bias operands could use
                # pipeline_mode=pl.Buffered(1) to drop the redundant second
                # buffer (~200 KiB); kept at the default buffering for
                # lowering robustness.
                pl.BlockSpec((D, n_pad), lambda i: (0, 0)),    # resident W
                pl.BlockSpec((1, n_pad), lambda i: (0, 0)),    # resident b
            ],
            out_specs=pl.BlockSpec((tile, n_pad), lambda i: (i, 0)),
        ),
        compiler_params=pltpu.CompilerParams(
            dimension_semantics=("parallel",),   # shard rows over TCs (v7x)
            vmem_limit_bytes=vmem_limit,
        ),
    )(h_flat, w_cat, b_cat)

    # Lazy, bf16 slicing of the fused slab (half the bytes of the old f32 slab).
    slot_logits = fused[:, :num_slots].reshape(B, S, num_slots)
    intent_logits = fused.reshape(B, S, n_pad)[
        :, 0, num_slots:num_slots + num_intents]
    return intent_logits, slot_logits


if __name__ == "__main__":
    # --- Model configuration (mirrors __init__) -----------------------------
    intents = ["greet", "book_flight", "play_music", "get_weather"]   # 4 intents
    recognized_slots = ["city", "date", "time"]
    slots = ["PAD", "O"]
    for s in recognized_slots:
        slots += ["B-" + s, "I-" + s]
    num_intents = len(intents)        # 4
    num_slots = len(slots)            # 8

    # --- Small example shapes ------------------------------------------------
    B, S = 2, 8                       # batch=2, seq=8, hidden=768

    key = jax.random.PRNGKey(0)
    k_h, k_wi, k_bi, k_ws, k_bs = jax.random.split(key, 5)

    # Synthetic DistilBERT hidden states (stand-in for self.bert(...)[0]).
    bert_outputs = jax.random.normal(k_h, (B, S, D_MODEL), dtype=jnp.float32)

    # Deterministic head params, matching torch.nn.Linear init:
    # U(-1/sqrt(in_features), 1/sqrt(in_features)).
    bound = 1.0 / (D_MODEL ** 0.5)
    wi = jax.random.uniform(k_wi, (D_MODEL, num_intents), jnp.float32, -bound, bound)
    bi = jax.random.uniform(k_bi, (1, num_intents), jnp.float32, -bound, bound)
    ws = jax.random.uniform(k_ws, (D_MODEL, num_slots), jnp.float32, -bound, bound)
    bs = jax.random.uniform(k_bs, (1, num_slots), jnp.float32, -bound, bound)

    # One-time parameter packing (hoisted out of the per-call hot path).
    w_cat, b_cat, ns, ni = prepare_head_params(wi, bi, ws, bs)

    intent_logits, slot_logits = jax.block_until_ready(
        joint_intent_and_slots(bert_outputs, w_cat, b_cat,
                               num_slots=ns, num_intents=ni)
    )

    # --- Reference checks ----------------------------------------------------
    # bf16-matmul reference (same numerics regime as the kernel path).
    h_bf = bert_outputs.astype(jnp.bfloat16)
    ref_slot_bf = jnp.einsum(
        "bsd,dn->bsn", h_bf, ws.astype(jnp.bfloat16),
        preferred_element_type=jnp.float32) + bs[0]
    ref_intent_bf = jnp.dot(
        h_bf[:, 0], wi.astype(jnp.bfloat16),
        preferred_element_type=jnp.float32) + bi[0]
    # Full-precision reference (loose tolerance: bf16 matmul + bf16 logits).
    ref_slot_f32 = jnp.einsum("bsd,dn->bsn", bert_outputs, ws) + bs[0]
    ref_intent_f32 = bert_outputs[:, 0] @ wi + bi[0]

    il = intent_logits.astype(jnp.float32)
    sl = slot_logits.astype(jnp.float32)

    assert intent_logits.shape == (B, num_intents)
    assert slot_logits.shape == (B, S, num_slots)
    assert jnp.allclose(il, ref_intent_bf, atol=3e-2, rtol=3e-2)
    assert jnp.allclose(sl, ref_slot_bf, atol=3e-2, rtol=3e-2)
    assert jnp.allclose(il, ref_intent_f32, atol=1e-1, rtol=1e-1)
    assert jnp.allclose(sl, ref_slot_f32, atol=1e-1, rtol=1e-1)

    print("KERNEL_OK")
</pallas_src>

<mosaic_0001>
module attributes {stable_mosaic.version = 11 : i64} {
  func.func @joint_heads_kernel(%arg0: i32, %arg1: memref<16x768xf32, #tpu.memory_space<vmem>>, %arg2: memref<768x128xbf16, #tpu.memory_space<vmem>>, %arg3: memref<1x128xf32, #tpu.memory_space<vmem>>, %arg4: memref<16x128xbf16, #tpu.memory_space<vmem>>) attributes {dimension_semantics = [#tpu.dimension_semantics<parallel>], iteration_bounds = array<i64: 1>, scalar_prefetch = 0 : i64, scratch_operands = 0 : i64, tpu.core_type = #tpu.core_type<tc>, window_params = [{transform_indices = @transform_0, window_bounds = array<i64: 16, 768>}, {pipeline_mode = #tpu.pipeline_mode<synchronous>, transform_indices = @transform_1, window_bounds = array<i64: 768, 128>}, {pipeline_mode = #tpu.pipeline_mode<synchronous>, transform_indices = @transform_2, window_bounds = array<i64: 1, 128>}, {transform_indices = @transform_3, window_bounds = array<i64: 16, 128>}]} {
    %c0 = arith.constant 0 : index
    %c0_0 = arith.constant 0 : index
    %0 = vector.load %arg1[%c0, %c0_0] : memref<16x768xf32, #tpu.memory_space<vmem>>, vector<16x768xf32>
    %1 = arith.truncf %0 : vector<16x768xf32> to vector<16x768xbf16>
    %c0_1 = arith.constant 0 : index
    %c0_2 = arith.constant 0 : index
    %2 = vector.load %arg2[%c0_1, %c0_2] : memref<768x128xbf16, #tpu.memory_space<vmem>>, vector<768x128xbf16>
    %cst = arith.constant dense<0.000000e+00> : vector<16x128xf32>
    %3 = tpu.matmul %1, %2, %cst {dimension_numbers = #tpu.dot_dimension_numbers<[1], [0], [0], [1], [0, 0, 1, 1], [], []>} : vector<16x768xbf16>, vector<768x128xbf16>, vector<16x128xf32> -> vector<16x128xf32>
    %c0_3 = arith.constant 0 : index
    %c0_4 = arith.constant 0 : index
    %4 = vector.load %arg3[%c0_3, %c0_4] : memref<1x128xf32, #tpu.memory_space<vmem>>, vector<1x128xf32>
    %5 = vector.broadcast %4 : vector<1x128xf32> to vector<16x128xf32>
    %6 = arith.addf %3, %5 : vector<16x128xf32>
    %7 = arith.truncf %6 : vector<16x128xf32> to vector<16x128xbf16>
    %c0_5 = arith.constant 0 : index
    %c0_6 = arith.constant 0 : index
    %8 = vector.load %arg4[%c0_5, %c0_6] : memref<16x128xbf16, #tpu.memory_space<vmem>>, vector<16x128xbf16>
    tpu.vector_store %arg4[%c0_5, %c0_6], %7 {strides = array<i32>} : memref<16x128xbf16, #tpu.memory_space<vmem>>, vector<16x128xbf16>,
    return
  }
  func.func @transform_0(%arg0: i32) -> (i32, i32) {
    %c0_i32 = arith.constant 0 : i32
    %c0_i32_0 = arith.constant 0 : i32
    return %arg0, %c0_i32 : i32, i32
  }
  func.func @transform_1(%arg0: i32) -> (i32, i32) {
    %c0_i32 = arith.constant 0 : i32
    %c0_i32_0 = arith.constant 0 : i32
    %c0_i32_1 = arith.constant 0 : i32
    return %c0_i32, %c0_i32_0 : i32, i32
  }
  func.func @transform_2(%arg0: i32) -> (i32, i32) {
    %c0_i32 = arith.constant 0 : i32
    %c0_i32_0 = arith.constant 0 : i32
    %c0_i32_1 = arith.constant 0 : i32
    return %c0_i32, %c0_i32_0 : i32, i32
  }
  func.func @transform_3(%arg0: i32) -> (i32, i32) {
    %c0_i32 = arith.constant 0 : i32
    %c0_i32_0 = arith.constant 0 : i32
    return %arg0, %c0_i32 : i32, i32
  }
}

</mosaic_0001>

<bundles_post_ra>
// kernel: joint_intent_and_slots.1
= control target key start
LH: loop header
LB: loop body
LE: loop exit
PB: predicated region body
PF: predicated region fallthrough
CT: control target
= control target key end

     0   :  { %8 = vsyncpa [#allocation3], 0  ;;  %s851_s0 = inlined_call_operand.hbm [shape: f32[16,768], index: 0, kind: input, shape index: {}]   ;;  %s852_s1 = inlined_call_operand.hbm [shape: bf16[768,128], index: 1, kind: input, shape index: {}]   ;;  %s853_s2 = inlined_call_operand.vmem [shape: f32[1,128], index: 2, kind: input, shape index: {}]   ;;  %s854_s3 = inlined_call_operand.vmem [shape: bf16[16,128], index: 3, kind: output, shape index: {}]  }
   0x1   :  { %9 = vsyncpa [#allocation5], 0  ;;  %s813_s12 = smov [#allocation2]  }
   0x2   :  { %s15_s13 = sshll.u32 %s813_s12, 4  ;;  %s16_s13 = int_to_ptr.vmem [resolvable:$true] %s15_s13 }
   0x3   :  { %s777_s14 = scalar_lea.vmem %s16_s13, 1536  ;;  %p782_p1 = scmp.lt.s32.totalorder %s16_s13, %s16_s13 }
   0x4   :  { %p778_p0 = scmp.ne.s32.totalorder %s16_s13, %s777_s14  ;;  %p783_p2 = scmp.lt.s32.totalorder %s777_s14, %s777_s14 }
   0x6   :  { %p784_p3 = por %p783_p2, %p782_p1 }
   0x8   :  { %p785_p4 = pnand %p784_p3, %p778_p0 }
   0xa   :  { %788 = shalt.err (!%p785_p4)
}
   0xb   :  { %s814_s15 = smov 768   ;;  %s815_s16 = smov 48  }
   0xc   :  { %21 = dma.hbm_to_vmem [thread:$0]  %s851_s0, 1536, %s16_s13, [#allocation3], %s814_s15, %s814_s15, %s815_s16  }
   0xd   :  { %s816_s19 = smov [#allocation4]  }
   0xe   :  { %s27_s20 = sshll.u32 %s816_s19, 4  ;;  %s28_s20 = int_to_ptr.vmem [resolvable:$true] %s27_s20 }
   0xf   :  { %s797_s21 = scalar_lea.vmem %s28_s20, 6144  ;;  %p802_p6 = scmp.lt.s32.totalorder %s28_s20, %s28_s20 }
  0x10   :  { %p798_p5 = scmp.ne.s32.totalorder %s28_s20, %s797_s21  ;;  %p803_p7 = scmp.lt.s32.totalorder %s797_s21, %s797_s21 }
  0x12   :  { %p804_p8 = por %p803_p7, %p802_p6 }
  0x14   :  { %p805_p9 = pnand %p804_p8, %p798_p5 }
  0x16   :  { %808 = shalt.err (!%p805_p9)
}
  0x17   :  { %s817_s22 = smov 64   ;;  %s818_s23 = smov 4  }
  0x18   :  { %33 = dma.hbm_to_vmem [thread:$0]  %s852_s1, 6144, %s28_s20, [#allocation5], %s817_s22, %s817_s22, %s818_s23  }
  0x19   :  { %809 = dma.done.wait [#allocation3], 1536  }
  0x1a   :  { %810 = vsyncadd [#allocation3], 4294965760 }
  0x1b   :  { %811 = dma.done.wait [#allocation5], 6144  }
  0x1c   :  { %812 = vsyncadd [#allocation5], 4294961152  ;;  %v721_v0 = vld [vmem:[#allocation4 + $0x78] sm:$0xff]   ;;  %v725_v4 = vld [vmem:[#allocation4 + $0x70] sm:$0xff]  }
  0x1d   :  { %v722_v1 = vld [vmem:[#allocation4 + $0x38] sm:$0xff]   ;;  %649 = vmatprep.subr.bf16.mxu0 %v721_v0  ;;  %v726_v5 = vld [vmem:[#allocation4 + $0x30] sm:$0xff]   ;;  %v729_v8 = vld [vmem:[#allocation4 + $0x68] sm:$0xff]  }
  0x1e   :  { %v723_v2 = vld [vmem:[#allocation4 + $0xf8] sm:$0xff]   ;;  %650 = vmatpush3.bf16.msra.mxu0 %v722_v1  ;;  %v727_v6 = vld [vmem:[#allocation4 + $0xf0] sm:$0xff]   ;;  %v730_v9 = vld [vmem:[#allocation4 + $0x28] sm:$0xff]  }
  0x1f   :  { %v724_v3 = vld [vmem:[#allocation4 + $0xb8] sm:$0xff]   ;;  %671 = vmatprep.subr.bf16.mxu1 %v723_v2  ;;  %651 = vmatprep.subr.bf16.mxu0 %v725_v4  ;;  %v728_v7 = vld [vmem:[#allocation4 + $0xb0] sm:$0xff]   ;;  %v731_v10 = vld [vmem:[#allocation4 + $0xe8] sm:$0xff]  }
  0x20   :  { %672 = vmatpush3.bf16.msra.mxu1 %v724_v3  ;;  %v732_v11 = vld [vmem:[#allocation4 + $0xa8] sm:$0xff]   ;;  %v733_v12 = vld [vmem:[#allocation4 + $0x60] sm:$0xff]   ;;  %v737_v16 = vld [vmem:[#allocation4 + $0x58] sm:$0xff]  }
  0x21   :  { %673 = vmatprep.subr.bf16.mxu1 %v727_v6  ;;  %v734_v13 = vld [vmem:[#allocation4 + $0x20] sm:$0xff]   ;;  %v738_v17 = vld [vmem:[#allocation4 + $0x18] sm:$0xff]   ;;  %v741_v20 = vld [vmem:[#allocation4 + $0x50] sm:$0xff]  }
  0x22   :  { %652 = vmatpush3.bf16.msra.mxu0 %v726_v5  ;;  %v735_v14 = vld [vmem:[#allocation4 + $0xe0] sm:$0xff]   ;;  %v739_v18 = vld [vmem:[#allocation4 + $0xd8] sm:$0xff]   ;;  %v742_v21 = vld [vmem:[#allocation4 + $0x10] sm:$0xff]  }
  0x23   :  { %653 = vmatprep.subr.bf16.mxu0 %v729_v8  ;;  %v736_v15 = vld [vmem:[#allocation4 + $0xa0] sm:$0xff]   ;;  %v740_v19 = vld [vmem:[#allocation4 + $0x98] sm:$0xff]   ;;  %v743_v22 = vld [vmem:[#allocation4 + $0xd0] sm:$0xff]  }
  0x24   :  { %674 = vmatpush3.bf16.msra.mxu1 %v728_v7  ;;  %v744_v23 = vld [vmem:[#allocation4 + $0x90] sm:$0xff]   ;;  %v745_v24 = vld [vmem:[#allocation4 + $0x48] sm:$0xff]   ;;  %v749_v28 = vld [vmem:[#allocation4 + $0x40] sm:$0xff]  }
  0x25   :  { %675 = vmatprep.subr.bf16.mxu1 %v731_v10  ;;  %v746_v25 = vld [vmem:[#allocation4 + $0x8] sm:$0xff]   ;;  %v750_v29 = vld [vmem:[#allocation4] sm:$0xff]   ;;  %v50_v32 = vld [vmem:[#allocation2 + $0x38] sm:$0xff] }
  0x26   :  { %654 = vmatpush3.bf16.msra.mxu0 %v730_v9  ;;  %v747_v26 = vld [vmem:[#allocation4 + $0xc8] sm:$0xff]   ;;  %v751_v30 = vld [vmem:[#allocation4 + $0xc0] sm:$0xff]   ;;  %v49_v36 = vld [vmem:[#allocation2 + $0x30] sm:$0xff] }
  0x27   :  { %655 = vmatprep.subr.bf16.mxu0 %v733_v12  ;;  %v748_v27 = vld [vmem:[#allocation4 + $0x88] sm:$0xff]   ;;  %v752_v34 = vld [vmem:[#allocation4 + $0x80] sm:$0xff]   ;;  %v753_v38 = vld [vmem:[#allocation4 + $0x178] sm:$0xff]  }
  0x28   :  { %676 = vmatpush3.bf16.msra.mxu1 %v732_v11  ;;  %v44_v31 = vld [vmem:[#allocation2 + $0x8] sm:$0xff]  ;;  %v43_v35 = vld [vmem:[#allocation2] sm:$0xff]  ;;  %v46_v39 = vld [vmem:[#allocation2 + $0x18] sm:$0xff] }
  0x29   :  { %677 = vmatprep.subr.bf16.mxu1 %v735_v14  ;;  %v56_v33 = vpack.c.bf16 %v50_v32, %v44_v31  ;;  %v55_v37 = vpack.c.bf16 %v49_v36, %v43_v35  ;;  %v52_v40 = vld [vmem:[#allocation2 + $0x48] sm:$0xff]  ;;  %v754_v42 = vld [vmem:[#allocation4 + $0x138] sm:$0xff]   ;;  %v45_v43 = vld [vmem:[#allocation2 + $0x10] sm:$0xff] }
  0x2a   :  { %656 = vmatpush3.bf16.msra.mxu0 %v734_v13  ;;  %v58_v41 = vpack.c.bf16 %v52_v40, %v46_v39  ;;  %v51_v44 = vld [vmem:[#allocation2 + $0x40] sm:$0xff]  ;;  %v755_v46 = vld [vmem:[#allocation4 + $0x170] sm:$0xff]   ;;  %v757_v48 = vld [vmem:[#allocation4 + $0x168] sm:$0xff]  }
  0x2b   :  { %657 = vmatprep.subr.bf16.mxu0 %v737_v16  ;;  %484 = vmatprep.mubr.bf16.mxu0 %v56_v33  ;;  %v57_v45 = vpack.c.bf16 %v51_v44, %v45_v43  ;;  %v756_v47 = vld [vmem:[#allocation4 + $0x130] sm:$0xff]   ;;  %v758_v49 = vld [vmem:[#allocation4 + $0x128] sm:$0xff]   ;;  %v759_v50 = vld [vmem:[#allocation4 + $0x160] sm:$0xff]  }
  0x2c   :  { %678 = vmatpush3.bf16.msra.mxu1 %v736_v15  ;;  %525 = vmatprep.mubr.bf16.mxu1 %v58_v41  ;;  %v760_v51 = vld [vmem:[#allocation4 + $0x120] sm:$0xff]   ;;  %v761_v52 = vld [vmem:[#allocation4 + $0x158] sm:$0xff]   ;;  %v763_v54 = vld [vmem:[#allocation4 + $0x150] sm:$0xff]  }
  0x2d   :  { %679 = vmatprep.subr.bf16.mxu1 %v739_v18  ;;  %v762_v53 = vld [vmem:[#allocation4 + $0x118] sm:$0xff]   ;;  %v48_v55 = vld [vmem:[#allocation2 + $0x28] sm:$0xff]  ;;  %v764_v58 = vld [vmem:[#allocation4 + $0x110] sm:$0xff]  }
  0x2e   :  { %658 = vmatpush3.bf16.msra.mxu0 %v738_v17  ;;  %v54_v56 = vld [vmem:[#allocation2 + $0x58] sm:$0xff]  ;;  %v765_v59 = vld [vmem:[#allocation4 + $0x148] sm:$0xff]   ;;  %v767_v61 = vld [vmem:[#allocation4 + $0x140] sm:$0xff]  }
  0x2f   :  { %659 = vmatprep.subr.bf16.mxu0 %v741_v20  ;;  %v60_v57 = vpack.c.bf16 %v54_v56, %v48_v55  ;;  %v766_v60 = vld [vmem:[#allocation4 + $0x108] sm:$0xff]   ;;  %v768_v62 = vld [vmem:[#allocation4 + $0x100] sm:$0xff]   ;;  %v53_v0 = vld [vmem:[#allocation2 + $0x50] sm:$0xff] }
  0x30   :  { %680 = vmatpush3.bf16.msra.mxu1 %v740_v19  ;;  %v47_v63 = vld [vmem:[#allocation2 + $0x20] sm:$0xff] }
  0x31   :  { %681 = vmatprep.subr.bf16.mxu1 %v743_v22  ;;  %v59_v1 = vpack.c.bf16 %v53_v0, %v47_v63  ;;  %v591_v11 = vld [vmem:[%s853_s2] ss:$0 sm:$0xff] }
  0x32   :  { %660 = vmatpush3.bf16.msra.mxu0 %v742_v21 }
  0x33   :  { %661 = vmatprep.subr.bf16.mxu0 %v745_v24 }
  0x34   :  { %682 = vmatpush3.bf16.msra.mxu1 %v744_v23 }
  0x35   :  { %683 = vmatprep.subr.bf16.mxu1 %v747_v26 }
  0x36   :  { %662 = vmatpush3.bf16.msra.mxu0 %v746_v25 }
  0x37   :  { %663 = vmatprep.subr.bf16.mxu0 %v749_v28 }
  0x38   :  { %684 = vmatpush3.bf16.msra.mxu1 %v748_v27 }
  0x39   :  { %685 = vmatprep.subr.bf16.mxu1 %v751_v30 }
  0x3a   :  { %664 = vmatpush3.bf16.msra.mxu0 %v750_v29 }
  0x3b   :  { %693 = vmatprep.subr.bf16.mxu0 %v753_v38 }
  0x3c   :  { %686 = vmatpush3.bf16.msra.mxu1 %v752_v34 }
  0x3d   :  { %485 = vmatmul.mubr.bf16.vlgmr.msra.gmra.mxu0 %v55_v37 }
  0x3e   :  { %694 = vmatpush3.bf16.msra.mxu0 %v754_v42  ;;  %566 = vmatprep.mubr.bf16.mxu0 %v60_v57 }
  0x3f   :  { %526 = vmatmul.mubr.bf16.vlgmr.msra.gmra.mxu1 %v57_v45  ;;  %695 = vmatprep.subr.bf16.mxu0 %v755_v46 }
  0x42   :  { %696 = vmatpush3.bf16.msra.mxu0 %v756_v47 }
  0x43   :  { %697 = vmatprep.subr.bf16.mxu0 %v757_v48 }
  0x46   :  { %698 = vmatpush3.bf16.msra.mxu0 %v758_v49 }
  0x47   :  { %699 = vmatprep.subr.bf16.mxu0 %v759_v50 }
  0x4a   :  { %700 = vmatpush3.bf16.msra.mxu0 %v760_v51 }
  0x4b   :  { %701 = vmatprep.subr.bf16.mxu0 %v761_v52 }
  0x4e   :  { %702 = vmatpush3.bf16.msra.mxu0 %v762_v53 }
  0x4f   :  { %703 = vmatprep.subr.bf16.mxu0 %v763_v54 }
  0x52   :  { %704 = vmatpush3.bf16.msra.mxu0 %v764_v58 }
  0x53   :  { %705 = vmatprep.subr.bf16.mxu0 %v765_v59 }
  0x56   :  { %706 = vmatpush3.bf16.msra.mxu0 %v766_v60 }
  0x57   :  { %707 = vmatprep.subr.bf16.mxu0 %v767_v61 }
  0x5a   :  { %708 = vmatpush3.bf16.msra.mxu0 %v768_v62 }
  0x5d   :  { %567 = vmatmul.mubr.bf16.vlgmr.msra.gmra.mxu0 %v59_v1 }
  0xfd   :  { %v665_v2 = vpop.f32.mrf.mxu0 }
  0xff   :  { %v666_v3 = vpop.f32.mrf.mxu0  ;;  %v687_v4 = vpop.f32.mrf.mxu1 }
 0x100   :  { %v667_v9 = vadd.f32 %v666_v3, %v665_v2 }
 0x101   :  { %v668_v5 = vpop.f32.mrf.mxu0  ;;  %v688_v6 = vpop.f32.mrf.mxu1 }
 0x102   :  { %v487_v15 = vadd.f32 %v667_v9, %v591_v11  ;;  %v689_v16 = vadd.f32 %v688_v6, %v687_v4 }
 0x103   :  { %v669_v7 = vpop.f32.mrf.mxu0  ;;  %v690_v8 = vpop.f32.mrf.mxu1 }
 0x104   :  { %v670_v10 = vadd.f32 %v669_v7, %v668_v5  ;;  %v528_v22 = vadd.f32 %v689_v16, %v487_v15 }
 0x105   :  { %v691_v12 = vpop.f32.mrf.mxu1 }
 0x106   :  { %v490_v17 = vadd.f32 %v670_v10, %v591_v11  ;;  %v692_v18 = vadd.f32 %v691_v12, %v690_v8 }
 0x108   :  { %v531_v23 = vadd.f32 %v692_v18, %v490_v17 }
 0x11d   :  { %v709_v13 = vpop.f32.mrf.mxu0 }
 0x11f   :  { %v710_v14 = vpop.f32.mrf.mxu0 }
 0x120   :  { %v711_v20 = vadd.f32 %v710_v14, %v709_v13 }
 0x121   :  { %v712_v19 = vpop.f32.mrf.mxu0 }
 0x122   :  { %v569_v25 = vadd.f32 %v711_v20, %v528_v22 }
 0x123   :  { %v713_v21 = vpop.f32.mrf.mxu0 }
 0x124   :  { %v714_v24 = vadd.f32 %v713_v21, %v712_v19 }
 0x126   :  { %v572_v26 = vadd.f32 %v714_v24, %v531_v23 }
 0x128   :  { %v647_v27 = vpack.c.bf16 %v572_v26, %v569_v25 }
 0x12a   :  { %648 = vst [vmem:[%s854_s3] sm:$0xff] %v647_v27  }
 0x12b   :  { %589 = vsyncpa [#allocation3], 1 }
 0x12c   :  { %590 = vsyncpa [#allocation5], 1 }

</bundles_post_ra>
